<compile_context>
chip_gen: v7x
topology: tpu7x:2x2x1
jax: 0.10.0
libtpu: 0.0.40
codegen_flags: <defaults>
</compile_context>

<pallas_src>
import functools

import jax
import jax.numpy as jnp
from jax.experimental import pallas as pl
from jax.experimental.pallas import tpu as pltpu


_MIB = 1024 * 1024
_FUSED_VMEM_BUDGET = 36 * _MIB   # conservative: leaves headroom inside v7x's 64 MiB physical VMEM
_TILED_VMEM_BUDGET = 28 * _MIB   # per-kernel block budget used when sizing tn


def _vmem_limit(nbytes):
    """Explicit scoped-VMEM request with ~25% headroom, clamped well under the
    smallest physical VMEM (64 MiB on v7x)."""
    return int(min(max(nbytes * 5 // 4 + _MIB, 32 * _MIB), 48 * _MIB))


def _pick_tile_n(C, N, in_itemsize, attn_itemsize, budget=_TILED_VMEM_BUDGET):
    """Largest lane-aligned (multiple-of-128) tn dividing N such that both
    kernels' double-buffered blocks + scratch stay under `budget`."""
    if N % 128 != 0:
        return N  # full-extent block (allowed); conv feature maps are normally 128-aligned

    def need(tn):
        # kernel 1: x block x2 (double buffered) + attn out block x2 + f32 acc + softmax temps
        k1 = 2 * C * tn * in_itemsize + 2 * C * C * attn_itemsize + 3 * C * C * 4
        # kernel 2: attn block x2 + x block x2 + out block x2 + f32 matmul temp
        k2 = 2 * C * C * attn_itemsize + 4 * C * tn * in_itemsize + C * tn * 4
        return max(k1, k2)

    best = 128
    for cand in range(128, N + 1, 128):
        if N % cand == 0 and need(cand) <= budget:
            best = cand
    return best


# --------------------------------------------------------------------------
# Kernel 1 (tiled path): accumulate energy = X @ X^T over N chunks, then apply
# the stable softmax and fold gamma in, once per batch element.
# --------------------------------------------------------------------------
def _cam_attention_kernel(gamma_ref, x_ref, attn_ref, acc_ref, *, mxu_dtype):
    # gamma_ref: SMEM scalar-prefetch ref, shape (1,) f32
    # x_ref:     (1, C, tn) VMEM input chunk
    # attn_ref:  (1, C, C)  VMEM output (written at the last N-chunk only)
    # acc_ref:   (C, C)     f32 VMEM scratch energy accumulator
    n = pl.program_id(1)

    @pl.when(n == 0)
    def _():
        acc_ref[...] = jnp.zeros_like(acc_ref)

    x = x_ref[0]
    if mxu_dtype is not None and x.dtype != mxu_dtype:
        x = x.astype(mxu_dtype)
    # energy chunk: X_chunk @ X_chunk^T, contracting N on both operands
    # (no explicit transpose / vxpose), f32 accumulation on the MXU.
    acc_ref[...] += jax.lax.dot_general(
        x, x,
        dimension_numbers=(((1,), (1,)), ((), ())),
        preferred_element_type=jnp.float32,
    )

    @pl.when(n == pl.num_programs(1) - 1)
    def _():
        energy = acc_ref[...]
        # softmax(rowmax(e) - e) in shift-invariant stable form:
        # exponent = rowmin(e) - e <= 0, so exp never overflows.
        row_min = jnp.min(energy, axis=-1, keepdims=True)
        p = jnp.exp(row_min - energy)
        denom = jnp.sum(p, axis=-1, keepdims=True)
        gamma = gamma_ref[0]
        # gamma is folded here (B*C*C multiplies) instead of in kernel 2
        # (B*C*N multiplies on the output tiles).
        attn_ref[0] = (gamma * (p / denom)).astype(attn_ref.dtype)


# --------------------------------------------------------------------------
# Kernel 2 (tiled path): out_chunk = (gamma*attn) @ X_chunk + X_chunk.
# --------------------------------------------------------------------------
def _cam_output_kernel(attn_ref, x_ref, o_ref, *, mxu_dtype):
    # attn_ref: (1, C, C)   gamma-scaled attention for this batch element
    #           (block index constant across n -> fetched once per batch)
    # x_ref:    (1, C, tn)  input chunk
    # o_ref:    (1, C, tn)  output chunk
    x = x_ref[0]
    attn = attn_ref[0]
    if mxu_dtype is not None:
        a_op = attn if attn.dtype == mxu_dtype else attn.astype(mxu_dtype)
        x_op = x if x.dtype == mxu_dtype else x.astype(mxu_dtype)
    else:
        # Deliberate: with no MXU dtype override, match the attention operand
        # to x's dtype (downcasts the f32 attention when x is bf16).
        a_op = attn if attn.dtype == x.dtype else attn.astype(x.dtype)
        x_op = x
    out = jnp.dot(a_op, x_op, preferred_element_type=jnp.float32)
    o_ref[0] = (out + x.astype(jnp.float32)).astype(o_ref.dtype)


# --------------------------------------------------------------------------
# Fused single-pass kernel (small/medium shapes): one HBM read of X per batch.
# --------------------------------------------------------------------------
def _cam_fused_kernel(gamma_ref, x_ref, o_ref, *, mxu_dtype):
    # gamma_ref: SMEM scalar-prefetch ref, shape (1,) f32
    # x_ref:     (1, C, N) full per-batch slab (VMEM resident)
    # o_ref:     (1, C, N) output slab
    x = x_ref[0]
    xc = x if (mxu_dtype is None or x.dtype == mxu_dtype) else x.astype(mxu_dtype)
    energy = jax.lax.dot_general(
        xc, xc,
        dimension_numbers=(((1,), (1,)), ((), ())),
        preferred_element_type=jnp.float32,
    )
    row_min = jnp.min(energy, axis=-1, keepdims=True)
    p = jnp.exp(row_min - energy)
    denom = jnp.sum(p, axis=-1, keepdims=True)
    attn = gamma_ref[0] * (p / denom)
    op_dtype = mxu_dtype if mxu_dtype is not None else x.dtype
    out = jnp.dot(attn.astype(op_dtype), xc, preferred_element_type=jnp.float32)
    o_ref[0] = (out + x.astype(jnp.float32)).astype(o_ref.dtype)


def cam_forward(x_nchw, gamma, *, tn=None, mxu_dtype=jnp.bfloat16, fused=None):
    """Channel Attention Module forward.

    x_nchw: (B, C, H, W); gamma: scalar. Returns (B, C, H, W), dtype of x.
    mxu_dtype: dtype for MXU operands (default bf16; accumulation stays f32).
               Use None for the exact-f32 path.
    fused:     force (True) / forbid (False) the single-pass fused kernel;
               None = auto based on a per-generation-safe VMEM budget.
    """
    B, C, H, W = x_nchw.shape
    N = H * W
    x_flat = x_nchw.reshape(B, C, N)
    in_itemsize = x_flat.dtype.itemsize
    attn_dtype = mxu_dtype if mxu_dtype is not None else jnp.float32
    attn_itemsize = jnp.dtype(attn_dtype).itemsize
    gamma_arr = jnp.asarray(gamma, jnp.float32).reshape(1)

    # x in + out out, both double-buffered, plus f32 softmax temporaries.
    fused_bytes = 4 * C * N * in_itemsize + 4 * C * C * 4 + C * C * attn_itemsize
    if fused is None:
        fused = fused_bytes <= _FUSED_VMEM_BUDGET

    if fused:
        out_flat = pl.pallas_call(
            functools.partial(_cam_fused_kernel, mxu_dtype=mxu_dtype),
            out_shape=jax.ShapeDtypeStruct((B, C, N), x_flat.dtype),
            grid_spec=pltpu.PrefetchScalarGridSpec(
                num_scalar_prefetch=1,
                grid=(B,),
                in_specs=[pl.BlockSpec((1, C, N), lambda b, g: (b, 0, 0))],
                out_specs=pl.BlockSpec((1, C, N), lambda b, g: (b, 0, 0)),
            ),
            compiler_params=pltpu.CompilerParams(
                dimension_semantics=("parallel",),
                vmem_limit_bytes=_vmem_limit(fused_bytes)),
            cost_estimate=pl.CostEstimate(
                flops=4 * B * C * C * N,
                transcendentals=B * C * C,
                bytes_accessed=2 * B * C * N * in_itemsize),
        )(gamma_arr, x_flat)
        return out_flat.reshape(B, C, H, W)

    # ---- Tiled two-kernel path -------------------------------------------
    if tn is None:
        tn = _pick_tile_n(C, N, in_itemsize, attn_itemsize)
    assert N % tn == 0, "spatial tile must divide H*W"
    n_chunks = N // tn

    k1_bytes = 2 * C * tn * in_itemsize + 2 * C * C * attn_itemsize + 3 * C * C * 4
    k2_bytes = 2 * C * C * attn_itemsize + 4 * C * tn * in_itemsize + C * tn * 4

    # ---- Kernel 1: per-batch gamma-scaled attention matrix (B, C, C) ----
    attn = pl.pallas_call(
        functools.partial(_cam_attention_kernel, mxu_dtype=mxu_dtype),
        out_shape=jax.ShapeDtypeStruct((B, C, C), attn_dtype),
        grid_spec=pltpu.PrefetchScalarGridSpec(
            num_scalar_prefetch=1,
            grid=(B, n_chunks),
            in_specs=[pl.BlockSpec((1, C, tn), lambda b, n, g: (b, 0, n))],
            out_specs=pl.BlockSpec((1, C, C), lambda b, n, g: (b, 0, 0)),
            scratch_shapes=[pltpu.VMEM((C, C), jnp.float32)],
        ),
        compiler_params=pltpu.CompilerParams(
            dimension_semantics=("parallel", "arbitrary"),
            vmem_limit_bytes=_vmem_limit(k1_bytes)),
        cost_estimate=pl.CostEstimate(
            flops=2 * B * C * C * N,
            transcendentals=B * C * C,
            bytes_accessed=B * C * N * in_itemsize + B * C * C * attn_itemsize),
    )(gamma_arr, x_flat)

    # ---- Kernel 2: out = attn @ X + X, chunked over N ----
    # NOTE: at very large C (>= 2048) on v7x consider single-buffering the attn
    # block (pipeline_mode=pl.Buffered(1)); it only changes per batch element.
    out_flat = pl.pallas_call(
        functools.partial(_cam_output_kernel, mxu_dtype=mxu_dtype),
        out_shape=jax.ShapeDtypeStruct((B, C, N), x_flat.dtype),
        grid_spec=pltpu.PrefetchScalarGridSpec(
            num_scalar_prefetch=0,
            grid=(B, n_chunks),
            in_specs=[
                pl.BlockSpec((1, C, C), lambda b, n: (b, 0, 0)),
                pl.BlockSpec((1, C, tn), lambda b, n: (b, 0, n)),
            ],
            out_specs=pl.BlockSpec((1, C, tn), lambda b, n: (b, 0, n)),
        ),
        compiler_params=pltpu.CompilerParams(
            dimension_semantics=("parallel", "parallel"),
            vmem_limit_bytes=_vmem_limit(k2_bytes)),
        cost_estimate=pl.CostEstimate(
            flops=2 * B * C * C * N,
            transcendentals=0,
            bytes_accessed=2 * B * C * N * in_itemsize + B * C * C * attn_itemsize),
    )(attn, x_flat)

    return out_flat.reshape(B, C, H, W)


def cam_reference(x, gamma, mxu_dtype=None):
    """Pure-JAX reference mirroring the PyTorch forward.

    With mxu_dtype set, it also mimics the kernel's MXU operand rounding
    (operands cast to mxu_dtype; accumulation in f32) for apples-to-apples
    comparison against the bf16 kernel path.
    """
    B, C, H, W = x.shape
    q = x.reshape(B, C, -1).astype(jnp.float32)            # (B, C, N)
    qc = q.astype(mxu_dtype).astype(jnp.float32) if mxu_dtype is not None else q
    energy = jnp.einsum("bcn,bdn->bcd", qc, qc)              # (B, C, C)
    energy_new = jnp.max(energy, -1, keepdims=True) - energy
    attention = jax.nn.softmax(energy_new, axis=-1)
    ga = jnp.float32(gamma) * attention
    if mxu_dtype is not None:
        ga = ga.astype(mxu_dtype).astype(jnp.float32)
    out = jnp.einsum("bcd,bdn->bcn", ga, qc).reshape(B, C, H, W)
    return (out + x.astype(jnp.float32)).astype(x.dtype)


if __name__ == "__main__":
    key = jax.random.PRNGKey(0)
    B, C, H, W = 2, 4, 16, 16
    x = jax.random.normal(key, (B, C, H, W), dtype=jnp.float32)

    # CAM.__init__ sets gamma = nn.Parameter(torch.zeros(1)); use a nonzero
    # value so the attention branch is actually exercised (gamma=0 -> out==x).
    gamma = jnp.float32(0.5)

    ref = cam_reference(x, gamma)

    # 1) Exact-f32 tiled two-kernel path; tn=128 -> two N-chunks per batch so
    #    the energy-accumulation loop is exercised.
    out = jax.block_until_ready(
        cam_forward(x, gamma, tn=128, mxu_dtype=None, fused=False))
    assert out.shape == (B, C, H, W)
    assert jnp.allclose(out, ref, atol=1e-4, rtol=1e-4), "tiled f32 mismatch"

    # 2) Exact-f32 fused single-pass path.
    out_fused = jax.block_until_ready(
        cam_forward(x, gamma, mxu_dtype=None, fused=True))
    assert jnp.allclose(out_fused, ref, atol=1e-4, rtol=1e-4), "fused f32 mismatch"

    # 3) Default bf16-MXU path (auto dispatch -> fused at this size), checked
    #    against a reference that mimics the bf16 operand rounding.
    ref_bf16 = cam_reference(x, gamma, mxu_dtype=jnp.bfloat16)
    out_bf16 = jax.block_until_ready(cam_forward(x, gamma))
    assert jnp.allclose(out_bf16, ref_bf16, atol=2e-2, rtol=2e-2), "fused bf16 mismatch"

    # 4) bf16-MXU tiled path (bf16 attention round trip through HBM).
    out_bf16_tiled = jax.block_until_ready(
        cam_forward(x, gamma, tn=128, fused=False))
    assert jnp.allclose(out_bf16_tiled, ref_bf16, atol=2e-2, rtol=2e-2), \
        "tiled bf16 mismatch"

    print("KERNEL_OK")
</pallas_src>

<mosaic_0001>
module attributes {stable_mosaic.version = 11 : i64} {
  func.func @_cam_attention_kernel(%arg0: i32, %arg1: i32, %arg2: memref<1xf32, #tpu.memory_space<smem>>, %arg3: memref<1x4x128xf32, #tpu.memory_space<vmem>>, %arg4: memref<1x4x4xf32, #tpu.memory_space<vmem>>, %arg5: memref<4x4xf32, #tpu.memory_space<vmem>>) attributes {dimension_semantics = [#tpu.dimension_semantics<parallel>, #tpu.dimension_semantics<arbitrary>], iteration_bounds = array<i64: 2, 2>, scalar_prefetch = 1 : i64, scratch_operands = 1 : i64, tpu.core_type = #tpu.core_type<tc>, window_params = [{transform_indices = @transform_0, window_bounds = array<i64: 1, 4, 128>}, {transform_indices = @transform_1, window_bounds = array<i64: 1, 4, 4>}]} {
    %c0_i32 = arith.constant 0 : i32
    %0 = arith.cmpi eq, %arg1, %c0_i32 : i32
    %1 = arith.extui %0 : i1 to i32
    %c0_i32_0 = arith.constant 0 : i32
    %2 = arith.cmpi ne, %1, %c0_i32_0 : i32
    scf.if %2 {
      %cst_8 = arith.constant 0.000000e+00 : f32
      %12 = vector.broadcast %cst_8 : f32 to vector<4x4xf32>
      %c0_9 = arith.constant 0 : index
      %c0_10 = arith.constant 0 : index
      %13 = vector.load %arg5[%c0_9, %c0_10] : memref<4x4xf32, #tpu.memory_space<vmem>>, vector<4x4xf32>
      tpu.vector_store %arg5[%c0_9, %c0_10], %12 {strides = array<i32>} : memref<4x4xf32, #tpu.memory_space<vmem>>, vector<4x4xf32>,
    } else {
    }
    %c0 = arith.constant 0 : index
    %c0_1 = arith.constant 0 : index
    %c0_2 = arith.constant 0 : index
    %3 = vector.load %arg3[%c0, %c0_1, %c0_2] : memref<1x4x128xf32, #tpu.memory_space<vmem>>, vector<1x4x128xf32>
    %4 = vector.shape_cast %3 : vector<1x4x128xf32> to vector<4x128xf32>
    %c0_3 = arith.constant 0 : index
    %c0_4 = arith.constant 0 : index
    %5 = vector.load %arg5[%c0_3, %c0_4] : memref<4x4xf32, #tpu.memory_space<vmem>>, vector<4x4xf32>
    %cst = arith.constant dense<0.000000e+00> : vector<4x4xf32>
    %6 = tpu.matmul %4, %4, %cst {dimension_numbers = #tpu.dot_dimension_numbers<[1], [1], [0], [0], [0, 0, 1, 0], [], []>} : vector<4x128xf32>, vector<4x128xf32>, vector<4x4xf32> -> vector<4x4xf32>
    %7 = arith.addf %5, %6 : vector<4x4xf32>
    %c0_5 = arith.constant 0 : index
    %c0_6 = arith.constant 0 : index
    %8 = vector.load %arg5[%c0_5, %c0_6] : memref<4x4xf32, #tpu.memory_space<vmem>>, vector<4x4xf32>
    tpu.vector_store %arg5[%c0_5, %c0_6], %7 {strides = array<i32>} : memref<4x4xf32, #tpu.memory_space<vmem>>, vector<4x4xf32>,
    %c1_i32 = arith.constant 1 : i32
    %9 = arith.cmpi eq, %arg1, %c1_i32 : i32
    %10 = arith.extui %9 : i1 to i32
    %c0_i32_7 = arith.constant 0 : i32
    %11 = arith.cmpi ne, %10, %c0_i32_7 : i32
    scf.if %11 {
      %c0_8 = arith.constant 0 : index
      %c0_9 = arith.constant 0 : index
      %12 = vector.load %arg5[%c0_8, %c0_9] : memref<4x4xf32, #tpu.memory_space<vmem>>, vector<4x4xf32>
      %cst_10 = arith.constant dense<0x7F800000> : vector<4xf32>
      %13 = vector.multi_reduction <minimumf>, %12, %cst_10 [1] : vector<4x4xf32> to vector<4xf32>
      %14 = vector.shape_cast %13 : vector<4xf32> to vector<4x1xf32>
      %15 = vector.broadcast %14 : vector<4x1xf32> to vector<4x4xf32>
      %16 = arith.subf %15, %12 : vector<4x4xf32>
      %17 = math.exp %16 : vector<4x4xf32>
      %cst_11 = arith.constant dense<0.000000e+00> : vector<4xf32>
      %18 = vector.multi_reduction <add>, %17, %cst_11 [1] : vector<4x4xf32> to vector<4xf32>
      %19 = vector.shape_cast %18 : vector<4xf32> to vector<4x1xf32>
      %c0_12 = arith.constant 0 : index
      %20 = memref.load %arg2[%c0_12] : memref<1xf32, #tpu.memory_space<smem>>
      %21 = vector.broadcast %19 : vector<4x1xf32> to vector<4x4xf32>
      %22 = arith.divf %17, %21 : vector<4x4xf32>
      %23 = vector.broadcast %20 : f32 to vector<4x4xf32>
      %24 = arith.mulf %23, %22 : vector<4x4xf32>
      %c0_13 = arith.constant 0 : index
      %c0_14 = arith.constant 0 : index
      %c0_15 = arith.constant 0 : index
      %25 = vector.load %arg4[%c0_13, %c0_14, %c0_15] : memref<1x4x4xf32, #tpu.memory_space<vmem>>, vector<1x4x4xf32>
      %26 = vector.shape_cast %25 : vector<1x4x4xf32> to vector<4x4xf32>
      %27 = vector.shape_cast %24 : vector<4x4xf32> to vector<1x4x4xf32>
      tpu.vector_store %arg4[%c0_13, %c0_14, %c0_15], %27 {strides = array<i32>} : memref<1x4x4xf32, #tpu.memory_space<vmem>>, vector<1x4x4xf32>,
    } else {
    }
    return
  }
  func.func @transform_0(%arg0: i32, %arg1: i32, %arg2: memref<1xf32, #tpu.memory_space<smem>>) -> (i32, i32, i32) {
    %c0_i32 = arith.constant 0 : i32
    %c0_i32_0 = arith.constant 0 : i32
    return %arg0, %c0_i32, %arg1 : i32, i32, i32
  }
  func.func @transform_1(%arg0: i32, %arg1: i32, %arg2: memref<1xf32, #tpu.memory_space<smem>>) -> (i32, i32, i32) {
    %c0_i32 = arith.constant 0 : i32
    %c0_i32_0 = arith.constant 0 : i32
    %c0_i32_1 = arith.constant 0 : i32
    return %arg0, %c0_i32, %c0_i32_0 : i32, i32, i32
  }
}

</mosaic_0001>

<bundles_post_ra>
// kernel: tpu_custom_call.1
= control target key start
LH: loop header
LB: loop body
LE: loop exit
PB: predicated region body
PF: predicated region fallthrough
CT: control target
= control target key end

     0   :  { %s886_s0 = inlined_call_operand.<no memory space> [shape: f32[1], index: 0, kind: input, shape index: {}]   ;;  %s887_s1 = inlined_call_operand.hbm [shape: f32[2,4,256], index: 1, kind: input, shape index: {}]   ;;  %s888_s2 = inlined_call_operand.hbm [shape: f32[2,4,4], index: 2, kind: output, shape index: {}]  }
   0x1   :  { %7 = sst [smem:[#allocation4]] %s886_s0 }
   0x2   :  { %8 = vsyncpa [#allocation6], 0 }
   0x3   :  { %10 = vsyncpa [#allocation6 + $0x1], 0 }
   0x4   :  { %11 = vsyncpa [#allocation7], 0 }
   0x5   :  { %13 = vsyncpa [#allocation7 + $0x1], 0  ;;  %s657_s11 = smov 0   ;;  %s659_s12 = smov 0  }
   0x6   :  { %s661_s13 = smov 0   ;;  %s663_s14 = smov 0  }
   0x7   :  { %s665_s15 = smov 0   ;;  %s667_s16 = smov 0  }
   0x8   :  { %s669_s17 = smov 0   ;;  %s671_s18 = smov 0  }
   0x9   :  { %s673_s0 = smov 0   ;;  %s675_s19 = smov 0  }
   0xa   :  { %s677_s20 = smov 0  }
   0xb LB: > { %s348_s21 = sadd.s32 4294967295, %s632_s20   ;;  %s349_s22 = sadd.s32 4294967294, %s632_s20   ;;  %s632_s20 = sphi %s677_s20, %s19_s20   ;;  %s628_s19 = sphi %s675_s19, %s908_s19   ;;  %s624_s0 = sphi %s673_s0, %s907_s0   ;;  %s620_s18 = sphi %s671_s18, %s906_s18   ;;  %s616_s17 = sphi %s669_s17, %s905_s17   ;;  %s612_s16 = sphi %s667_s16, %s904_s16   ;;  %s608_s15 = sphi %s665_s15, %s903_s15   ;;  %s604_s14 = sphi %s663_s14, %s902_s14   ;;  %s600_s13 = sphi %s661_s13, %s901_s13   ;;  %s596_s12 = sphi %s659_s12, %s900_s12   ;;  %s592_s11 = sphi %s657_s11, %s899_s11  }
   0xc   : > { %s28_s23 = sadd.s32 1, %s624_s0  ;;  %s31_s24 = sadd.s32 1, %s628_s19 }
   0xd   : > { %p29_p0 = scmp.ge.s32.totalorder %s28_s23, 2  ;;  %s40_s25 = sadd.s32 1, %s612_s16 }
   0xe   : > { %p47_p1 = scmp.ne.s32.totalorder %s612_s16, %s608_s15  ;;  %p48_p2 = scmp.eq.s32.totalorder %s632_s20, 0 }
   0xf   : > { %s910_s23 = smov (%p29_p0, %s28_s23), 0  ;;  %s912_s24 = smov (!%p29_p0, %s31_s24), %s628_s19 }
  0x10   : > { %s36_s26 = ssub.s32 %s624_s0, %s910_s23  ;;  %p723_p3 = por %p48_p2, %p47_p1 }
  0x11   : > { %p33_p4 = scmp.ge.s32.totalorder %s912_s24, 2  ;;  %p53_p5 = scmp.ne.s32.totalorder %s608_s15, %s604_s14 }
  0x12   : > { %p54_p6 = scmp.eq.s32.totalorder %s348_s21, 0  ;;  %s66_s28 = sadd.s32 1, %s600_s13 }
  0x13   : > { %s914_s24 = smov (%p33_p4, %s912_s24), 0  ;;  %p76_p8 = scmp.ne.s32.totalorder %s600_s13, %s596_s12 }
  0x14   : > { %p731_p7 = por %p54_p6, %p53_p5  ;;  %s35_s30 = ssub.s32 %s628_s19, %s914_s24 }
  0x15   : > { %p77_p9 = scmp.eq.s32.totalorder %s348_s21, 3  ;;  %s37_s3 = sor.u32 %s36_s26, %s35_s30 }
  0x16   : > { %p64_p10 = scmp.eq.s32.totalorder %s35_s30, 0  ;;  %p38_p11 = scmp.eq.s32.totalorder %s37_s3, 0 }
  0x17   : > { %p739_p12 = por %p77_p9, %p76_p8  ;;  %p82_p13 = scmp.ne.s32.totalorder %s596_s12, %s592_s11 }
  0x18   : > { %s744_s5 = scalar_select %p64_p10, %s600_s13, %s66_s28  }
  0x19   : > { %s892_s4 = scalar_select %p739_p12, 1, 0 }
  0x1a   : > { %s747_s6 = scalar_select %p38_p11, %s612_s16, %s40_s25  }
  0x1b   : > { %p83_p0 = scmp.eq.s32.totalorder %s349_s22, 3  ;;  %p383_p1 = scmp.lt.s32.totalorder %s632_s20, 4 }
  0x1c   : > { %s103_s8 = sand.u32 1, %s612_s16   ;;  %s353_s10 = sshll.u32 %s628_s19, 1 }
  0x1d   : > { %p752_p2 = por %p83_p0, %p82_p13  ;;  %s352_s9 = sshll.u32 %s103_s8, 2 }
  0x1e   : > { %s112_s14 = sadd.s32 %s624_s0, %s353_s10  ;;  %s107_s21 = scalar_lea.vmem [#allocation5], %s352_s9 }
  0x1f   : > { %s893_s7 = scalar_select %p752_p2, 1, 0 }
  0x20   : > { %s116_s26 = sshll.u32 %s107_s21, 4  ;;  %s354_s30 = sshll.u32 %s112_s14, 6  ;;  %s759_s26 = int_to_ptr.vmem [resolvable:$true] %s116_s26 }
  0x21   : > { %s764_s3 = scalar_lea.hbm %s887_s1, %s354_s30  ;;  %p768_p4 = pnand %p383_p1, %p723_p3 }
  0x22   : > { %s104_s9 = scalar_lea.sflag [#allocation6], %s103_s8  ;;  %s480_s10 = scalar_lea.hbm %s764_s3, 64 }
  0x23   : > { %p481_p8 = scmp.ne.s32.totalorder %s764_s3, %s480_s10  ;;  %p482_p9 = pneg %p768_p4 }
  0x24   : > { %s485_s21 = scalar_lea.hbm %s887_s1, 256  ;;  %p486_p3 = scmp.lt.u32.totalorder %s764_s3, %s887_s1 }
  0x25   : > { %p483_p10 = pnand %p482_p9, %p481_p8  ;;  %p487_p13 = scmp.lt.u32.totalorder %s485_s21, %s480_s10 }
  0x26   : > { %p489_p1 = scmp.lt.u32.totalorder %s480_s10, %s764_s3 }
  0x27   : > { %p484_p11 = pneg %p483_p10  ;;  %p488_p0 = por %p487_p13, %p486_p3 }
  0x29   : > { %p490_p5 = por %p489_p1, %p488_p0 }
  0x2b   : > { %p491_p6 = pnand %p490_p5, %p484_p11 }
  0x2d   : > { %494 = shalt.err (!%p491_p6)
}
  0x2e   : > { %s495_s8 = scalar_lea.vmem %s759_s26, 64  ;;  %s634_s25 = smov [#allocation5]  }
  0x2f   : > { %p496_p8 = scmp.ne.s32.totalorder %s759_s26, %s495_s8  ;;  %s500_s27 = sshll.u32 %s634_s25, 4  ;;  %s501_s27 = int_to_ptr.vmem [resolvable:$false] %s500_s27 }
  0x30   : > { %s502_s14 = scalar_lea.vmem %s501_s27, 128  ;;  %p503_p12 = scmp.lt.s32.totalorder %s759_s26, %s501_s27 }
  0x31   : > { %p498_p10 = pnand %p496_p8, %p482_p9  ;;  %p504_p3 = scmp.lt.s32.totalorder %s502_s14, %s495_s8 }
  0x33   : > { %p499_p2 = pneg %p498_p10  ;;  %p505_p13 = por %p504_p3, %p503_p12 }
  0x35   : > { %p506_p0 = pnand %p505_p13, %p499_p2 }
  0x37   : > { %509 = shalt.err (!%p506_p0)
}
  0x38   : > { %378 = dma.hbm_to_vmem [thread:$0]  (!%p768_p4), %s764_s3, 64, %s759_s26, %s104_s9  }
  0x39   : > { %p895_p5 = scmp.lt.s32.totalorder %s632_s20, 5  ;;  %p896_p6 = scmp.ge.s32.totalorder %s632_s20, 1 }
  0x3b   : > { %p122_p9 = pnand %p896_p6, %p895_p5 }
  0x3c   : > { %s127_s10 = sand.u32 (!%p122_p9), 1, %s608_s15  }
  0x3d   : > { %125 = sbr.rel (%p122_p9) target bundleno = 647 (0x287), region = 24  ;;  %s356_s21 = sshll.u32 (!%p122_p9), %s127_s10, 2 }
  0x3e   : > { %s128_s30 = scalar_lea.sflag (!%p122_p9), [#allocation6], %s127_s10  ;;  %s131_s28 = scalar_lea.vmem (!%p122_p9), [#allocation5], %s356_s21 }
  0x44   : > { %583 = dma.done.wait (%p731_p7), %s128_s30, 64  }
  0x45   : > { %585 = vsyncadd (%p731_p7), %s128_s30, 4294967232  ;;  %s147_s22 = sand.u32 1, %s596_s12   ;;  %p358_p12 = scmp.ne.s32.totalorder %s616_s17, 0 }
  0x46   : > { %s811_s26 = sshll.u32 %s147_s22, 2  ;;  %vm154_vm0 = vcmask (!%p358_p12), 27648   ;;  %v635_v0 = vmov (!%p358_p12), 0.0  }
  0x47   : > { %s149_s3 = scalar_lea.vmem [#allocation8], %s811_s26  ;;  %153 = sbr.rel (%p358_p12) target bundleno = 78 (0x4e), region = 32  ;;  %155 = vst.msk [vmem:[#allocation2] sm:$0xf] (!%p358_p12), %vm154_vm0, %v635_v0 }
  0x4e PF: > { %v156_v1 = vld [vmem:[%s131_s28] sm:$0xf]  ;;  %v636_v2 = vmov 0.0   ;;  %vm637_vm1 = vmmov 0   ;;  %v157_v3 = vld [vmem:[#allocation2] sm:$0xf] }
  0x4f   : > { %366 = vmatprep.subr.mxu0 %v636_v2  ;;  %368 = vmatprep.mubr.msk.f32.mxu0 %vm637_vm1, %v636_v2  ;;  %vm229_vm2 = vcmask 27648   ;;  %p359_p7 = scmp.ne.s32.totalorder %s616_s17, 1 }
  0x50   : > { %367 = vmatpush3.xpose.msra.mxu0 %v156_v1  ;;  %s245_s29 = sld [smem:[#allocation4]] (!%p359_p7) }
  0x53   : > { %369 = vmatmul.mubr.f32.vlgmr.msra.gmra.mrb[0].mxu0 %v156_v1 }
  0x56   : > { %v248_v16 = vstv (!%p359_p7), %s245_s29 }
 0x123   : > { %234 = sbr.rel (%p359_p7) target bundleno = 622 (0x26e), region = 36 }
 0x126   : > { %v224_v4 = vpop.f32.mrb[0].mxu0 }
 0x127   : > { %v228_v5 = vadd.f32 %v224_v4, %v157_v3  ;;  %v370_v6 = vpop.f32.mrb[1].mxu0 }
 0x129   : > { %230 = vst.msk [vmem:[#allocation2] sm:$0xf] %vm229_vm2, %v228_v5 }
 0x130   : > { %v235_v7 = vld [vmem:[#allocation2] sm:$0xf] }
 0x131   : > { %v236_v8 = vsel %vm229_vm2, %v235_v7, inf }
 0x132   : > { %237 = vmin.xlane.f32.xlu0 %v236_v8 }
 0x1bf   : > { %v238_v9 = vpop.xlane.xlu0 %237 }
 0x1c0   : > { %v239_v10 = vsub.f32 %v238_v9, %v235_v7 }
 0x1c2   : > { %v240_v11 = vmul.f32 1.442695, %v239_v10 }
 0x1c4   : > { %476 = vpow2.f32 %v240_v11 }
 0x1ce   : > { %v477_v12 = vpop.eup %476 }
 0x1cf   : > { %v242_v13 = vsel %vm229_vm2, %v477_v12, 0.0 }
 0x1d0   : > { %243 = vadd.xlane.f32.xlu0 %v242_v13 }
 0x25d   : > { %v244_v14 = vpop.xlane.xlu0 %243 }
 0x25e   : > { %478 = vrcp.f32 %v244_v14 }
 0x268   : > { %v479_v15 = vpop.eup %478 }
 0x269   : > { %v247_v17 = vmul.f32 %v479_v15, %v477_v12 }
 0x26b   : > { %v249_v18 = vmul.f32 %v248_v16, %v247_v17 }
 0x26d   : > { %250 = vst.msk [vmem:[%s149_s3] sm:$0xf] %vm229_vm2, %v249_v18 }
 0x26e PF: > { %s361_s17 = sshll.u32 %s620_s18, 6  ;;  %s265_s27 = sshll.u32 %s149_s3, 4  ;;  %s266_s27 = int_to_ptr.vmem [resolvable:$true] %s265_s27 }
 0x26f   : > { %s826_s25 = scalar_lea.hbm %s888_s2, %s361_s17  ;;  %s252_s14 = scalar_lea.sflag [#allocation7], %s147_s22 }
 0x270   : > { %s510_s10 = scalar_lea.vmem %s266_s27, 64  ;;  %p897_p4 = scmp.ne.s32.totalorder %s892_s4, 0 }
 0x271   : > { %p511_p2 = scmp.ne.s32.totalorder %s266_s27, %s510_s10  ;;  %s638_s21 = smov [#allocation8]  }
 0x272   : > { %s514_s30 = sshll.u32 %s638_s21, 4  ;;  %s515_s30 = int_to_ptr.vmem [resolvable:$false] %s514_s30 }
 0x273   : > { %p512_p11 = pnand %p511_p2, %p897_p4  ;;  %s516_s28 = scalar_lea.vmem %s515_s30, 128 }
 0x274   : > { %p517_p8 = scmp.lt.s32.totalorder %s266_s27, %s515_s30  ;;  %p518_p10 = scmp.lt.s32.totalorder %s516_s28, %s510_s10 }
 0x275   : > { %p513_p1 = pneg %p512_p11 }
 0x276   : > { %p519_p3 = por %p518_p10, %p517_p8 }
 0x278   : > { %p520_p13 = pnand %p519_p3, %p513_p1 }
 0x27a   : > { %523 = shalt.err (!%p520_p13)
}
 0x27b   : > { %s524_s18 = scalar_lea.hbm %s826_s25, 64  ;;  %s528_s3 = scalar_lea.hbm %s888_s2, 128 }
 0x27c   : > { %p525_p0 = scmp.ne.s32.totalorder %s826_s25, %s524_s18  ;;  %p529_p9 = scmp.lt.u32.totalorder %s826_s25, %s888_s2 }
 0x27d   : > { %p530_p12 = scmp.lt.u32.totalorder %s528_s3, %s524_s18  ;;  %p532_p2 = scmp.lt.u32.totalorder %s524_s18, %s826_s25 }
 0x27e   : > { %p526_p5 = pnand %p525_p0, %p897_p4 }
 0x27f   : > { %p531_p7 = por %p530_p12, %p529_p9 }
 0x280   : > { %p527_p6 = pneg %p526_p5 }
 0x281   : > { %p533_p11 = por %p532_p2, %p531_p7 }
 0x283   : > { %p534_p1 = pnand %p533_p11, %p527_p6 }
 0x285   : > { %537 = shalt.err (!%p534_p1)
}
 0x286   : > { %373 = dma.vmem_to_hbm [thread:$0]  (%p897_p4), %s266_s27, 64, %s826_s25, %s252_s14  }
 0x287 PF: > { %p384_p8 = scmp.ge.s32.totalorder %s632_s20, 2  ;;  %s277_s9 = sand.u32 1, %s592_s11  }
 0x288   : > { %p898_p10 = scmp.ne.s32.totalorder %s893_s7, 0  ;;  %s278_s8 = scalar_lea.sflag [#allocation7], %s277_s9 }
 0x28a   : > { %p380_p3 = pnand %p384_p8, %p898_p10 }
 0x28c   : > { %587 = dma.done.wait (!%p380_p3), %s278_s8, 64  }
 0x28d   : > { %589 = vsyncadd (!%p380_p3), %s278_s8, 4294967232  ;;  %s19_s20 = sadd.s32 1, %s632_s20   ;;  %s899_s11 = smov %s596_s12 }
 0x28e   : > { %p16_p13 = scmp.ge.s32.totalorder %s19_s20, 6   ;;  %s900_s12 = smov %s600_s13 }
 0x28f   : > { %s901_s13 = smov %s744_s5  ;;  %s902_s14 = smov %s608_s15 }
 0x290   : > { %s903_s15 = smov %s612_s16  ;;  %s904_s16 = smov %s747_s6 }
 0x291   : > { %s905_s17 = smov %s624_s0  ;;  %s906_s18 = smov %s628_s19 }
 0x292   : > { %s907_s0 = smov %s910_s23  ;;  %s908_s19 = smov %s914_s24 }
 0x293   :  { %18 = sbr.rel (!%p16_p13) target bundleno = 11 (0xb), region = 77 }
 0x29a   :  { %283 = vsyncpa [#allocation6], 1 }
 0x29b   :  { %285 = vsyncpa [#allocation6 + $0x1], 1 }
 0x29c   :  { %286 = vsyncpa [#allocation7], 1 }
 0x29d   :  { %288 = vsyncpa [#allocation7 + $0x1], 1 }

</bundles_post_ra>
